<compile_context>
chip_gen: v5e
topology: v5e:2x2
jax: 0.10.0
libtpu: 0.0.40
codegen_flags: <defaults>
</compile_context>

<pallas_src>
import functools

import jax
import jax.numpy as jnp
import numpy as np
from jax.experimental import pallas as pl
from jax.experimental.pallas import tpu as pltpu


# ---------------------------------------------------------------------------
# Fused per-batch kernel: InceptionModule x2 -> feature map; GAP -> FC
# ---------------------------------------------------------------------------
def _inception_cam_kernel(x_ref, wb1_ref, wc1_ref, wmp1_ref, b1_ref,
                          wb2_ref, wc2_ref, wmp2_ref, b2_ref,
                          wfc_ref, bfc_ref,
                          feat_ref, logits_ref, *, L, kmax):
    pmax = (kmax - 1) // 2
    inv_L = 1.0 / L

    # Position vector + masks: built once per grid step, reused everywhere
    # (broadcast (1, L) -> (C, L) along sublanes is cheap).
    t_row = jax.lax.broadcasted_iota(jnp.int32, (1, L), 1)           # (1, L)
    shift_masks = []
    for c in range(kmax):                                            # static
        s = c - pmax
        if s == 0:
            shift_masks.append((0, None))
        else:
            shift_masks.append(
                (s, jnp.logical_and(t_row + s >= 0, t_row + s < L)))
    has_left = t_row >= 1
    has_right = t_row <= L - 2

    def shifted_copies(b):
        """im2col rows: b shifted by s = -pmax..pmax along time, zero-padded
        at the segment edges (XLU roll + precomputed masks, registers only)."""
        blocks = []
        for s, valid in shift_masks:                                 # static unroll
            if s == 0:
                blocks.append(b)
            else:
                rolled = pltpu.roll(b, shift=(-s) % L, axis=1)       # [:, j]=b[:, j+s]
                blocks.append(jnp.where(valid, rolled, 0.0))
        return jnp.concatenate(blocks, axis=0)                       # (kmax*nf, L)

    def maxpool3(z):
        """MaxPool1d(kernel=3, stride=1, padding=1) along time."""
        left = jnp.where(has_left, pltpu.roll(z, shift=1, axis=1), z)
        right = jnp.where(has_right, pltpu.roll(z, shift=L - 1, axis=1), z)
        return jnp.maximum(jnp.maximum(left, z), right)

    def inception_module(z, wb, wc, wmp, bias):
        # bottleneck 1x1 conv (bias-free)
        b = jnp.dot(wb, z, preferred_element_type=jnp.float32)       # (nf, L)
        # three 'same' convs as ONE im2col matmul (BN scale folded into wc)
        conv3 = jnp.dot(wc, shifted_copies(b),
                        preferred_element_type=jnp.float32)          # (3nf, L)
        # maxpool branch 1x1 conv (BN scale folded into wmp) — no zero rows
        mpc = jnp.dot(wmp, maxpool3(z),
                      preferred_element_type=jnp.float32)            # (nf, L)
        out = jnp.concatenate([conv3, mpc], axis=0) + bias           # (4nf, L)
        return jnp.maximum(out, 0.0)                                 # BN bias + ReLU

    x = x_ref[...]                                                   # (c_in, L)
    f1 = inception_module(x, wb1_ref[...], wc1_ref[...], wmp1_ref[...], b1_ref[...])
    f2 = inception_module(f1, wb2_ref[...], wc2_ref[...], wmp2_ref[...], b2_ref[...])

    # feature_map written directly in its final per-batch layout.
    feat_ref[...] = f2.astype(feat_ref.dtype)                        # (4nf, L)

    # GAP over time (in-kernel lane reduction) + Linear head, per batch element.
    g = jnp.sum(f2, axis=1, keepdims=True) * inv_L                   # (4nf, 1)
    lo = jnp.dot(wfc_ref[...], g, preferred_element_type=jnp.float32)  # (nc, 1)
    logits_ref[...] = (lo + bfc_ref[...]).astype(logits_ref.dtype)   # (nc, 1)


# ---------------------------------------------------------------------------
# Host-side weight folding (im2col weight layout, BatchNorm scale fold)
# ---------------------------------------------------------------------------
def _branch_rows(w, kmax):
    """(nf, nf, k) conv weight -> (nf, kmax*nf) im2col row block (odd k only)."""
    nf, _, k = w.shape
    off = (kmax - 1) // 2 - k // 2
    wp = jnp.pad(w, ((0, 0), (0, 0), (off, kmax - k - off)))   # centre within kmax taps
    return jnp.transpose(wp, (0, 2, 1)).reshape(nf, kmax * nf)


def _fold_module_params(p, c_in, nf, kmax):
    scale = p['scale']                                               # (4nf,)
    wb = p['wb'][:, :, 0]                                            # (nf, c_in)
    # Three conv branches only (no zero-padded maxpool rows).
    wc = jnp.concatenate(
        [_branch_rows(p['w1'], kmax), _branch_rows(p['w2'], kmax),
         _branch_rows(p['w3'], kmax)], axis=0) * scale[:3 * nf, None]   # (3nf, kmax*nf)
    # Maxpool 1x1 branch only (no zero-padded conv rows).
    wmp = p['wmp'][:, :, 0] * scale[3 * nf:, None]                   # (nf, c_in)
    return wb, wc, wmp, p['bias'][:, None]                           # bias (4nf, 1)


# ---------------------------------------------------------------------------
# InceptionTime_CAM forward (features -> feature_map, gap -> flat -> fc)
# ---------------------------------------------------------------------------
def inceptiontime_cam_forward(x, params):
    N, c_in, L = x.shape
    nf = params['m1']['wb'].shape[0]
    c_out = 4 * nf
    n_classes = params['w_fc'].shape[0]
    kss = (params['m1']['w1'].shape[-1], params['m1']['w2'].shape[-1],
           params['m1']['w3'].shape[-1])
    assert all(k % 2 == 1 for k in kss), "odd kernel sizes only ('same' centering)"
    kmax = max(kss)

    wb1, wc1, wmp1, b1 = _fold_module_params(params['m1'], c_in, nf, kmax)
    wb2, wc2, wmp2, b2 = _fold_module_params(params['m2'], c_out, nf, kmax)
    wfc = params['w_fc']                                             # (nc, 4nf)
    bfc = params['b_fc'][:, None]                                    # (nc, 1)

    def _const_spec(arr):
        nd = arr.ndim
        return pl.BlockSpec(arr.shape, lambda i, _nd=nd: (0,) * _nd)

    in_specs = [
        # activations: one batch element per grid step
        pl.BlockSpec((pl.Squeezed(), c_in, L), lambda i: (i, 0, 0)),
        # weights/biases: constant index maps -> fetched once, VMEM-resident
        _const_spec(wb1), _const_spec(wc1), _const_spec(wmp1), _const_spec(b1),
        _const_spec(wb2), _const_spec(wc2), _const_spec(wmp2), _const_spec(b2),
        _const_spec(wfc), _const_spec(bfc),
    ]
    out_specs = (
        # feature_map written directly in final (N, 4nf, L) layout
        pl.BlockSpec((pl.Squeezed(), c_out, L), lambda i: (i, 0, 0)),
        # per-batch logits column (nc is tiny -> inherently a partial store)
        pl.BlockSpec((pl.Squeezed(), n_classes, 1), lambda i: (i, 0, 0)),
    )
    out_shape = (
        jax.ShapeDtypeStruct((N, c_out, L), x.dtype),
        jax.ShapeDtypeStruct((N, n_classes, 1), x.dtype),
    )

    flops_per_batch = (
        2 * nf * c_in * L + 2 * (3 * nf) * (kmax * nf) * L + 2 * nf * c_in * L
        + 2 * nf * c_out * L + 2 * (3 * nf) * (kmax * nf) * L + 2 * nf * c_out * L
        + 2 * n_classes * c_out)
    bytes_accessed = 4 * int(
        x.size + wb1.size + wc1.size + wmp1.size + b1.size
        + wb2.size + wc2.size + wmp2.size + b2.size + wfc.size + bfc.size
        + N * c_out * L + N * n_classes)
    cost = pl.CostEstimate(flops=int(N * flops_per_batch), transcendentals=0,
                           bytes_accessed=bytes_accessed)

    kernel = functools.partial(_inception_cam_kernel, L=L, kmax=kmax)
    feat, logits3 = pl.pallas_call(
        kernel,
        grid=(N,),
        in_specs=in_specs,
        out_specs=out_specs,
        out_shape=out_shape,
        compiler_params=pltpu.CompilerParams(
            dimension_semantics=("parallel",),
            vmem_limit_bytes=32 * 1024 * 1024),
        cost_estimate=cost,
    )(x, wb1, wc1, wmp1, b1, wb2, wc2, wmp2, b2, wfc, bfc)

    logits = logits3[:, :, 0]                                        # (N, nc)
    return logits, feat


# ---------------------------------------------------------------------------
# Deterministic parameter initialization (synthetic "inceptiontime" backbone)
# ---------------------------------------------------------------------------
def _module_params(key, c_in, nf, kss):
    ks = jax.random.split(key, 9)
    c_out = 4 * nf
    p = {
        'wb':  0.2 * jax.random.normal(ks[0], (nf, c_in, 1), jnp.float32),
        'w1':  0.2 * jax.random.normal(ks[1], (nf, nf, kss[0]), jnp.float32),
        'w2':  0.2 * jax.random.normal(ks[2], (nf, nf, kss[1]), jnp.float32),
        'w3':  0.2 * jax.random.normal(ks[3], (nf, nf, kss[2]), jnp.float32),
        'wmp': 0.2 * jax.random.normal(ks[4], (nf, c_in, 1), jnp.float32),
    }
    gamma = 1.0 + 0.1 * jax.random.normal(ks[5], (c_out,), jnp.float32)
    beta = 0.1 * jax.random.normal(ks[6], (c_out,), jnp.float32)
    mean = 0.05 * jax.random.normal(ks[7], (c_out,), jnp.float32)
    var = jnp.abs(jax.random.normal(ks[8], (c_out,), jnp.float32)) + 0.5
    scale = gamma / jnp.sqrt(var + 1e-5)
    p['scale'] = scale
    p['bias'] = beta - mean * scale
    return p


def init_params(key, c_in=4, nf=8, n_classes=5, kss=(9, 5, 3)):
    k1, k2, k3, k4 = jax.random.split(key, 4)
    return {
        'm1': _module_params(k1, c_in, nf, kss),
        'm2': _module_params(k2, 4 * nf, nf, kss),
        'w_fc': 0.2 * jax.random.normal(k3, (n_classes, 4 * nf), jnp.float32),
        'b_fc': 0.1 * jax.random.normal(k4, (n_classes,), jnp.float32),
    }


# ---------------------------------------------------------------------------
# Pure-JAX reference (independent implementation via lax conv / reduce_window)
# ---------------------------------------------------------------------------
def ref_forward(x, params):
    def conv1d(z, w):
        k = w.shape[-1]
        return jax.lax.conv_general_dilated(
            z, w, window_strides=(1,), padding=[(k // 2, k // 2)],
            dimension_numbers=('NCH', 'OIH', 'NCH'))

    def module(z, p):
        b = conv1d(z, p['wb'])
        y1 = conv1d(b, p['w1'])
        y2 = conv1d(b, p['w2'])
        y3 = conv1d(b, p['w3'])
        mp = jax.lax.reduce_window(z, -jnp.inf, jax.lax.max,
                                   (1, 1, 3), (1, 1, 1),
                                   [(0, 0), (0, 0), (1, 1)])
        ymp = conv1d(mp, p['wmp'])
        out = jnp.concatenate([y1, y2, y3, ymp], axis=1)
        out = out * p['scale'][None, :, None] + p['bias'][None, :, None]
        return jnp.maximum(out, 0.0)

    f = module(module(x, params['m1']), params['m2'])
    gap = f.mean(axis=-1)
    logits = gap @ params['w_fc'].T + params['b_fc']
    return logits, f


if __name__ == "__main__":
    key = jax.random.PRNGKey(0)
    kx, kp = jax.random.split(key)

    N, C_IN, L = 2, 4, 16
    NF, NCLS = 8, 5

    x = jax.random.normal(kx, (N, C_IN, L), jnp.float32)
    params = init_params(kp, c_in=C_IN, nf=NF, n_classes=NCLS)

    fwd = jax.jit(inceptiontime_cam_forward)
    logits, feature_map = fwd(x, params)
    logits = jax.block_until_ready(logits)
    feature_map = jax.block_until_ready(feature_map)

    ref_logits, ref_feat = ref_forward(x, params)
    assert np.allclose(np.asarray(feature_map), np.asarray(ref_feat),
                       atol=2e-4, rtol=2e-4)
    assert np.allclose(np.asarray(logits), np.asarray(ref_logits),
                       atol=2e-4, rtol=2e-4)
    print("KERNEL_OK")
</pallas_src>

<mosaic_0001>
module attributes {stable_mosaic.version = 11 : i64} {
  func.func @_inception_cam_kernel(%arg0: i32, %arg1: memref<1x4x16xf32, #tpu.memory_space<vmem>>, %arg2: memref<8x4xf32, #tpu.memory_space<vmem>>, %arg3: memref<24x72xf32, #tpu.memory_space<vmem>>, %arg4: memref<8x4xf32, #tpu.memory_space<vmem>>, %arg5: memref<32x1xf32, #tpu.memory_space<vmem>>, %arg6: memref<8x32xf32, #tpu.memory_space<vmem>>, %arg7: memref<24x72xf32, #tpu.memory_space<vmem>>, %arg8: memref<8x32xf32, #tpu.memory_space<vmem>>, %arg9: memref<32x1xf32, #tpu.memory_space<vmem>>, %arg10: memref<5x32xf32, #tpu.memory_space<vmem>>, %arg11: memref<5x1xf32, #tpu.memory_space<vmem>>, %arg12: memref<1x32x16xf32, #tpu.memory_space<vmem>>, %arg13: memref<1x5x1xf32, #tpu.memory_space<vmem>>) attributes {dimension_semantics = [#tpu.dimension_semantics<parallel>], iteration_bounds = array<i64: 2>, scalar_prefetch = 0 : i64, scratch_operands = 0 : i64, tpu.core_type = #tpu.core_type<tc>, window_params = [{transform_indices = @transform_0, window_bounds = array<i64: 1, 4, 16>}, {pipeline_mode = #tpu.pipeline_mode<synchronous>, transform_indices = @transform_1, window_bounds = array<i64: 8, 4>}, {pipeline_mode = #tpu.pipeline_mode<synchronous>, transform_indices = @transform_2, window_bounds = array<i64: 24, 72>}, {pipeline_mode = #tpu.pipeline_mode<synchronous>, transform_indices = @transform_3, window_bounds = array<i64: 8, 4>}, {pipeline_mode = #tpu.pipeline_mode<synchronous>, transform_indices = @transform_4, window_bounds = array<i64: 32, 1>}, {pipeline_mode = #tpu.pipeline_mode<synchronous>, transform_indices = @transform_5, window_bounds = array<i64: 8, 32>}, {pipeline_mode = #tpu.pipeline_mode<synchronous>, transform_indices = @transform_6, window_bounds = array<i64: 24, 72>}, {pipeline_mode = #tpu.pipeline_mode<synchronous>, transform_indices = @transform_7, window_bounds = array<i64: 8, 32>}, {pipeline_mode = #tpu.pipeline_mode<synchronous>, transform_indices = @transform_8, window_bounds = array<i64: 32, 1>}, {pipeline_mode = #tpu.pipeline_mode<synchronous>, transform_indices = @transform_9, window_bounds = array<i64: 5, 32>}, {pipeline_mode = #tpu.pipeline_mode<synchronous>, transform_indices = @transform_10, window_bounds = array<i64: 5, 1>}, {transform_indices = @transform_11, window_bounds = array<i64: 1, 32, 16>}, {transform_indices = @transform_12, window_bounds = array<i64: 1, 5, 1>}]} {
    %0 = tpu.iota {dimensions = array<i32: 1>} : vector<1x16xi32>
    %c-4_i32 = arith.constant -4 : i32
    %1 = vector.broadcast %c-4_i32 : i32 to vector<1x16xi32>
    %2 = arith.addi %0, %1 : vector<1x16xi32>
    %c0_i32 = arith.constant 0 : i32
    %3 = vector.broadcast %c0_i32 : i32 to vector<1x16xi32>
    %4 = arith.cmpi sge, %2, %3 : vector<1x16xi32>
    %c-4_i32_0 = arith.constant -4 : i32
    %5 = vector.broadcast %c-4_i32_0 : i32 to vector<1x16xi32>
    %6 = arith.addi %0, %5 : vector<1x16xi32>
    %c16_i32 = arith.constant 16 : i32
    %7 = vector.broadcast %c16_i32 : i32 to vector<1x16xi32>
    %8 = arith.cmpi slt, %6, %7 : vector<1x16xi32>
    %9 = arith.andi %4, %8 : vector<1x16xi1>
    %c-3_i32 = arith.constant -3 : i32
    %10 = vector.broadcast %c-3_i32 : i32 to vector<1x16xi32>
    %11 = arith.addi %0, %10 : vector<1x16xi32>
    %c0_i32_1 = arith.constant 0 : i32
    %12 = vector.broadcast %c0_i32_1 : i32 to vector<1x16xi32>
    %13 = arith.cmpi sge, %11, %12 : vector<1x16xi32>
    %c-3_i32_2 = arith.constant -3 : i32
    %14 = vector.broadcast %c-3_i32_2 : i32 to vector<1x16xi32>
    %15 = arith.addi %0, %14 : vector<1x16xi32>
    %c16_i32_3 = arith.constant 16 : i32
    %16 = vector.broadcast %c16_i32_3 : i32 to vector<1x16xi32>
    %17 = arith.cmpi slt, %15, %16 : vector<1x16xi32>
    %18 = arith.andi %13, %17 : vector<1x16xi1>
    %c-2_i32 = arith.constant -2 : i32
    %19 = vector.broadcast %c-2_i32 : i32 to vector<1x16xi32>
    %20 = arith.addi %0, %19 : vector<1x16xi32>
    %c0_i32_4 = arith.constant 0 : i32
    %21 = vector.broadcast %c0_i32_4 : i32 to vector<1x16xi32>
    %22 = arith.cmpi sge, %20, %21 : vector<1x16xi32>
    %c-2_i32_5 = arith.constant -2 : i32
    %23 = vector.broadcast %c-2_i32_5 : i32 to vector<1x16xi32>
    %24 = arith.addi %0, %23 : vector<1x16xi32>
    %c16_i32_6 = arith.constant 16 : i32
    %25 = vector.broadcast %c16_i32_6 : i32 to vector<1x16xi32>
    %26 = arith.cmpi slt, %24, %25 : vector<1x16xi32>
    %27 = arith.andi %22, %26 : vector<1x16xi1>
    %c-1_i32 = arith.constant -1 : i32
    %28 = vector.broadcast %c-1_i32 : i32 to vector<1x16xi32>
    %29 = arith.addi %0, %28 : vector<1x16xi32>
    %c0_i32_7 = arith.constant 0 : i32
    %30 = vector.broadcast %c0_i32_7 : i32 to vector<1x16xi32>
    %31 = arith.cmpi sge, %29, %30 : vector<1x16xi32>
    %c-1_i32_8 = arith.constant -1 : i32
    %32 = vector.broadcast %c-1_i32_8 : i32 to vector<1x16xi32>
    %33 = arith.addi %0, %32 : vector<1x16xi32>
    %c16_i32_9 = arith.constant 16 : i32
    %34 = vector.broadcast %c16_i32_9 : i32 to vector<1x16xi32>
    %35 = arith.cmpi slt, %33, %34 : vector<1x16xi32>
    %36 = arith.andi %31, %35 : vector<1x16xi1>
    %c1_i32 = arith.constant 1 : i32
    %37 = vector.broadcast %c1_i32 : i32 to vector<1x16xi32>
    %38 = arith.addi %0, %37 : vector<1x16xi32>
    %c0_i32_10 = arith.constant 0 : i32
    %39 = vector.broadcast %c0_i32_10 : i32 to vector<1x16xi32>
    %40 = arith.cmpi sge, %38, %39 : vector<1x16xi32>
    %c1_i32_11 = arith.constant 1 : i32
    %41 = vector.broadcast %c1_i32_11 : i32 to vector<1x16xi32>
    %42 = arith.addi %0, %41 : vector<1x16xi32>
    %c16_i32_12 = arith.constant 16 : i32
    %43 = vector.broadcast %c16_i32_12 : i32 to vector<1x16xi32>
    %44 = arith.cmpi slt, %42, %43 : vector<1x16xi32>
    %45 = arith.andi %40, %44 : vector<1x16xi1>
    %c2_i32 = arith.constant 2 : i32
    %46 = vector.broadcast %c2_i32 : i32 to vector<1x16xi32>
    %47 = arith.addi %0, %46 : vector<1x16xi32>
    %c0_i32_13 = arith.constant 0 : i32
    %48 = vector.broadcast %c0_i32_13 : i32 to vector<1x16xi32>
    %49 = arith.cmpi sge, %47, %48 : vector<1x16xi32>
    %c2_i32_14 = arith.constant 2 : i32
    %50 = vector.broadcast %c2_i32_14 : i32 to vector<1x16xi32>
    %51 = arith.addi %0, %50 : vector<1x16xi32>
    %c16_i32_15 = arith.constant 16 : i32
    %52 = vector.broadcast %c16_i32_15 : i32 to vector<1x16xi32>
    %53 = arith.cmpi slt, %51, %52 : vector<1x16xi32>
    %54 = arith.andi %49, %53 : vector<1x16xi1>
    %c3_i32 = arith.constant 3 : i32
    %55 = vector.broadcast %c3_i32 : i32 to vector<1x16xi32>
    %56 = arith.addi %0, %55 : vector<1x16xi32>
    %c0_i32_16 = arith.constant 0 : i32
    %57 = vector.broadcast %c0_i32_16 : i32 to vector<1x16xi32>
    %58 = arith.cmpi sge, %56, %57 : vector<1x16xi32>
    %c3_i32_17 = arith.constant 3 : i32
    %59 = vector.broadcast %c3_i32_17 : i32 to vector<1x16xi32>
    %60 = arith.addi %0, %59 : vector<1x16xi32>
    %c16_i32_18 = arith.constant 16 : i32
    %61 = vector.broadcast %c16_i32_18 : i32 to vector<1x16xi32>
    %62 = arith.cmpi slt, %60, %61 : vector<1x16xi32>
    %63 = arith.andi %58, %62 : vector<1x16xi1>
    %c4_i32 = arith.constant 4 : i32
    %64 = vector.broadcast %c4_i32 : i32 to vector<1x16xi32>
    %65 = arith.addi %0, %64 : vector<1x16xi32>
    %c0_i32_19 = arith.constant 0 : i32
    %66 = vector.broadcast %c0_i32_19 : i32 to vector<1x16xi32>
    %67 = arith.cmpi sge, %65, %66 : vector<1x16xi32>
    %c4_i32_20 = arith.constant 4 : i32
    %68 = vector.broadcast %c4_i32_20 : i32 to vector<1x16xi32>
    %69 = arith.addi %0, %68 : vector<1x16xi32>
    %c16_i32_21 = arith.constant 16 : i32
    %70 = vector.broadcast %c16_i32_21 : i32 to vector<1x16xi32>
    %71 = arith.cmpi slt, %69, %70 : vector<1x16xi32>
    %72 = arith.andi %67, %71 : vector<1x16xi1>
    %c1_i32_22 = arith.constant 1 : i32
    %73 = vector.broadcast %c1_i32_22 : i32 to vector<1x16xi32>
    %74 = arith.cmpi sge, %0, %73 : vector<1x16xi32>
    %c14_i32 = arith.constant 14 : i32
    %75 = vector.broadcast %c14_i32 : i32 to vector<1x16xi32>
    %76 = arith.cmpi sle, %0, %75 : vector<1x16xi32>
    %c0 = arith.constant 0 : index
    %c0_23 = arith.constant 0 : index
    %c0_24 = arith.constant 0 : index
    %77 = vector.load %arg1[%c0, %c0_23, %c0_24] : memref<1x4x16xf32, #tpu.memory_space<vmem>>, vector<1x4x16xf32>
    %78 = vector.shape_cast %77 : vector<1x4x16xf32> to vector<4x16xf32>
    %c0_25 = arith.constant 0 : index
    %c0_26 = arith.constant 0 : index
    %79 = vector.load %arg2[%c0_25, %c0_26] : memref<8x4xf32, #tpu.memory_space<vmem>>, vector<8x4xf32>
    %c0_27 = arith.constant 0 : index
    %c0_28 = arith.constant 0 : index
    %80 = vector.load %arg3[%c0_27, %c0_28] : memref<24x72xf32, #tpu.memory_space<vmem>>, vector<24x72xf32>
    %c0_29 = arith.constant 0 : index
    %c0_30 = arith.constant 0 : index
    %81 = vector.load %arg4[%c0_29, %c0_30] : memref<8x4xf32, #tpu.memory_space<vmem>>, vector<8x4xf32>
    %c0_31 = arith.constant 0 : index
    %c0_32 = arith.constant 0 : index
    %82 = vector.load %arg5[%c0_31, %c0_32] : memref<32x1xf32, #tpu.memory_space<vmem>>, vector<32x1xf32>
    %cst = arith.constant dense<0.000000e+00> : vector<8x16xf32>
    %83 = tpu.matmul %79, %78, %cst {dimension_numbers = #tpu.dot_dimension_numbers<[1], [0], [0], [1], [0, 0, 1, 1], [], []>} : vector<8x4xf32>, vector<4x16xf32>, vector<8x16xf32> -> vector<8x16xf32>
    %c4_i32_33 = arith.constant 4 : i32
    %84 = tpu.dynamic_rotate %83 by %c4_i32_33 dim 1 : vector<8x16xf32>, i32 -> vector<8x16xf32>
    %cst_34 = arith.constant 0.000000e+00 : f32
    %85 = vector.shape_cast %9 : vector<1x16xi1> to vector<1x16xi1>
    %86 = vector.broadcast %85 : vector<1x16xi1> to vector<8x16xi1>
    %87 = vector.broadcast %cst_34 : f32 to vector<8x16xf32>
    %88 = arith.select %86, %84, %87 : vector<8x16xi1>, vector<8x16xf32>
    %c3_i32_35 = arith.constant 3 : i32
    %89 = tpu.dynamic_rotate %83 by %c3_i32_35 dim 1 : vector<8x16xf32>, i32 -> vector<8x16xf32>
    %cst_36 = arith.constant 0.000000e+00 : f32
    %90 = vector.shape_cast %18 : vector<1x16xi1> to vector<1x16xi1>
    %91 = vector.broadcast %90 : vector<1x16xi1> to vector<8x16xi1>
    %92 = vector.broadcast %cst_36 : f32 to vector<8x16xf32>
    %93 = arith.select %91, %89, %92 : vector<8x16xi1>, vector<8x16xf32>
    %c2_i32_37 = arith.constant 2 : i32
    %94 = tpu.dynamic_rotate %83 by %c2_i32_37 dim 1 : vector<8x16xf32>, i32 -> vector<8x16xf32>
    %cst_38 = arith.constant 0.000000e+00 : f32
    %95 = vector.shape_cast %27 : vector<1x16xi1> to vector<1x16xi1>
    %96 = vector.broadcast %95 : vector<1x16xi1> to vector<8x16xi1>
    %97 = vector.broadcast %cst_38 : f32 to vector<8x16xf32>
    %98 = arith.select %96, %94, %97 : vector<8x16xi1>, vector<8x16xf32>
    %c1_i32_39 = arith.constant 1 : i32
    %99 = tpu.dynamic_rotate %83 by %c1_i32_39 dim 1 : vector<8x16xf32>, i32 -> vector<8x16xf32>
    %cst_40 = arith.constant 0.000000e+00 : f32
    %100 = vector.shape_cast %36 : vector<1x16xi1> to vector<1x16xi1>
    %101 = vector.broadcast %100 : vector<1x16xi1> to vector<8x16xi1>
    %102 = vector.broadcast %cst_40 : f32 to vector<8x16xf32>
    %103 = arith.select %101, %99, %102 : vector<8x16xi1>, vector<8x16xf32>
    %c15_i32 = arith.constant 15 : i32
    %104 = tpu.dynamic_rotate %83 by %c15_i32 dim 1 : vector<8x16xf32>, i32 -> vector<8x16xf32>
    %cst_41 = arith.constant 0.000000e+00 : f32
    %105 = vector.shape_cast %45 : vector<1x16xi1> to vector<1x16xi1>
    %106 = vector.broadcast %105 : vector<1x16xi1> to vector<8x16xi1>
    %107 = vector.broadcast %cst_41 : f32 to vector<8x16xf32>
    %108 = arith.select %106, %104, %107 : vector<8x16xi1>, vector<8x16xf32>
    %c14_i32_42 = arith.constant 14 : i32
    %109 = tpu.dynamic_rotate %83 by %c14_i32_42 dim 1 : vector<8x16xf32>, i32 -> vector<8x16xf32>
    %cst_43 = arith.constant 0.000000e+00 : f32
    %110 = vector.shape_cast %54 : vector<1x16xi1> to vector<1x16xi1>
    %111 = vector.broadcast %110 : vector<1x16xi1> to vector<8x16xi1>
    %112 = vector.broadcast %cst_43 : f32 to vector<8x16xf32>
    %113 = arith.select %111, %109, %112 : vector<8x16xi1>, vector<8x16xf32>
    %c13_i32 = arith.constant 13 : i32
    %114 = tpu.dynamic_rotate %83 by %c13_i32 dim 1 : vector<8x16xf32>, i32 -> vector<8x16xf32>
    %cst_44 = arith.constant 0.000000e+00 : f32
    %115 = vector.shape_cast %63 : vector<1x16xi1> to vector<1x16xi1>
    %116 = vector.broadcast %115 : vector<1x16xi1> to vector<8x16xi1>
    %117 = vector.broadcast %cst_44 : f32 to vector<8x16xf32>
    %118 = arith.select %116, %114, %117 : vector<8x16xi1>, vector<8x16xf32>
    %c12_i32 = arith.constant 12 : i32
    %119 = tpu.dynamic_rotate %83 by %c12_i32 dim 1 : vector<8x16xf32>, i32 -> vector<8x16xf32>
    %cst_45 = arith.constant 0.000000e+00 : f32
    %120 = vector.shape_cast %72 : vector<1x16xi1> to vector<1x16xi1>
    %121 = vector.broadcast %120 : vector<1x16xi1> to vector<8x16xi1>
    %122 = vector.broadcast %cst_45 : f32 to vector<8x16xf32>
    %123 = arith.select %121, %119, %122 : vector<8x16xi1>, vector<8x16xf32>
    %124 = tpu.concatenate %88, %93, %98, %103, %83, %108, %113, %118, %123 in 0 : vector<8x16xf32>, vector<8x16xf32>, vector<8x16xf32>, vector<8x16xf32>, vector<8x16xf32>, vector<8x16xf32>, vector<8x16xf32>, vector<8x16xf32>, vector<8x16xf32> -> vector<72x16xf32>
    %cst_46 = arith.constant dense<0.000000e+00> : vector<24x16xf32>
    %125 = tpu.matmul %80, %124, %cst_46 {dimension_numbers = #tpu.dot_dimension_numbers<[1], [0], [0], [1], [0, 0, 1, 1], [], []>} : vector<24x72xf32>, vector<72x16xf32>, vector<24x16xf32> -> vector<24x16xf32>
    %c1_i32_47 = arith.constant 1 : i32
    %126 = tpu.dynamic_rotate %78 by %c1_i32_47 dim 1 : vector<4x16xf32>, i32 -> vector<4x16xf32>
    %127 = vector.shape_cast %74 : vector<1x16xi1> to vector<1x16xi1>
    %128 = vector.broadcast %127 : vector<1x16xi1> to vector<4x16xi1>
    %129 = arith.select %128, %126, %78 : vector<4x16xi1>, vector<4x16xf32>
    %c15_i32_48 = arith.constant 15 : i32
    %130 = tpu.dynamic_rotate %78 by %c15_i32_48 dim 1 : vector<4x16xf32>, i32 -> vector<4x16xf32>
    %131 = vector.shape_cast %76 : vector<1x16xi1> to vector<1x16xi1>
    %132 = vector.broadcast %131 : vector<1x16xi1> to vector<4x16xi1>
    %133 = arith.select %132, %130, %78 : vector<4x16xi1>, vector<4x16xf32>
    %134 = arith.maximumf %129, %78 : vector<4x16xf32>
    %135 = arith.maximumf %134, %133 : vector<4x16xf32>
    %cst_49 = arith.constant dense<0.000000e+00> : vector<8x16xf32>
    %136 = tpu.matmul %81, %135, %cst_49 {dimension_numbers = #tpu.dot_dimension_numbers<[1], [0], [0], [1], [0, 0, 1, 1], [], []>} : vector<8x4xf32>, vector<4x16xf32>, vector<8x16xf32> -> vector<8x16xf32>
    %137 = tpu.concatenate %125, %136 in 0 : vector<24x16xf32>, vector<8x16xf32> -> vector<32x16xf32>
    %138 = vector.broadcast %82 : vector<32x1xf32> to vector<32x16xf32>
    %139 = arith.addf %137, %138 : vector<32x16xf32>
    %cst_50 = arith.constant 0.000000e+00 : f32
    %140 = vector.broadcast %cst_50 : f32 to vector<32x16xf32>
    %141 = arith.maximumf %139, %140 : vector<32x16xf32>
    %c0_51 = arith.constant 0 : index
    %c0_52 = arith.constant 0 : index
    %142 = vector.load %arg6[%c0_51, %c0_52] : memref<8x32xf32, #tpu.memory_space<vmem>>, vector<8x32xf32>
    %c0_53 = arith.constant 0 : index
    %c0_54 = arith.constant 0 : index
    %143 = vector.load %arg7[%c0_53, %c0_54] : memref<24x72xf32, #tpu.memory_space<vmem>>, vector<24x72xf32>
    %c0_55 = arith.constant 0 : index
    %c0_56 = arith.constant 0 : index
    %144 = vector.load %arg8[%c0_55, %c0_56] : memref<8x32xf32, #tpu.memory_space<vmem>>, vector<8x32xf32>
    %c0_57 = arith.constant 0 : index
    %c0_58 = arith.constant 0 : index
    %145 = vector.load %arg9[%c0_57, %c0_58] : memref<32x1xf32, #tpu.memory_space<vmem>>, vector<32x1xf32>
    %cst_59 = arith.constant dense<0.000000e+00> : vector<8x16xf32>
    %146 = tpu.matmul %142, %141, %cst_59 {dimension_numbers = #tpu.dot_dimension_numbers<[1], [0], [0], [1], [0, 0, 1, 1], [], []>} : vector<8x32xf32>, vector<32x16xf32>, vector<8x16xf32> -> vector<8x16xf32>
    %c4_i32_60 = arith.constant 4 : i32
    %147 = tpu.dynamic_rotate %146 by %c4_i32_60 dim 1 : vector<8x16xf32>, i32 -> vector<8x16xf32>
    %cst_61 = arith.constant 0.000000e+00 : f32
    %148 = vector.shape_cast %9 : vector<1x16xi1> to vector<1x16xi1>
    %149 = vector.broadcast %148 : vector<1x16xi1> to vector<8x16xi1>
    %150 = vector.broadcast %cst_61 : f32 to vector<8x16xf32>
    %151 = arith.select %149, %147, %150 : vector<8x16xi1>, vector<8x16xf32>
    %c3_i32_62 = arith.constant 3 : i32
    %152 = tpu.dynamic_rotate %146 by %c3_i32_62 dim 1 : vector<8x16xf32>, i32 -> vector<8x16xf32>
    %cst_63 = arith.constant 0.000000e+00 : f32
    %153 = vector.shape_cast %18 : vector<1x16xi1> to vector<1x16xi1>
    %154 = vector.broadcast %153 : vector<1x16xi1> to vector<8x16xi1>
    %155 = vector.broadcast %cst_63 : f32 to vector<8x16xf32>
    %156 = arith.select %154, %152, %155 : vector<8x16xi1>, vector<8x16xf32>
    %c2_i32_64 = arith.constant 2 : i32
    %157 = tpu.dynamic_rotate %146 by %c2_i32_64 dim 1 : vector<8x16xf32>, i32 -> vector<8x16xf32>
    %cst_65 = arith.constant 0.000000e+00 : f32
    %158 = vector.shape_cast %27 : vector<1x16xi1> to vector<1x16xi1>
    %159 = vector.broadcast %158 : vector<1x16xi1> to vector<8x16xi1>
    %160 = vector.broadcast %cst_65 : f32 to vector<8x16xf32>
    %161 = arith.select %159, %157, %160 : vector<8x16xi1>, vector<8x16xf32>
    %c1_i32_66 = arith.constant 1 : i32
    %162 = tpu.dynamic_rotate %146 by %c1_i32_66 dim 1 : vector<8x16xf32>, i32 -> vector<8x16xf32>
    %cst_67 = arith.constant 0.000000e+00 : f32
    %163 = vector.shape_cast %36 : vector<1x16xi1> to vector<1x16xi1>
    %164 = vector.broadcast %163 : vector<1x16xi1> to vector<8x16xi1>
    %165 = vector.broadcast %cst_67 : f32 to vector<8x16xf32>
    %166 = arith.select %164, %162, %165 : vector<8x16xi1>, vector<8x16xf32>
    %c15_i32_68 = arith.constant 15 : i32
    %167 = tpu.dynamic_rotate %146 by %c15_i32_68 dim 1 : vector<8x16xf32>, i32 -> vector<8x16xf32>
    %cst_69 = arith.constant 0.000000e+00 : f32
    %168 = vector.shape_cast %45 : vector<1x16xi1> to vector<1x16xi1>
    %169 = vector.broadcast %168 : vector<1x16xi1> to vector<8x16xi1>
    %170 = vector.broadcast %cst_69 : f32 to vector<8x16xf32>
    %171 = arith.select %169, %167, %170 : vector<8x16xi1>, vector<8x16xf32>
    %c14_i32_70 = arith.constant 14 : i32
    %172 = tpu.dynamic_rotate %146 by %c14_i32_70 dim 1 : vector<8x16xf32>, i32 -> vector<8x16xf32>
    %cst_71 = arith.constant 0.000000e+00 : f32
    %173 = vector.shape_cast %54 : vector<1x16xi1> to vector<1x16xi1>
    %174 = vector.broadcast %173 : vector<1x16xi1> to vector<8x16xi1>
    %175 = vector.broadcast %cst_71 : f32 to vector<8x16xf32>
    %176 = arith.select %174, %172, %175 : vector<8x16xi1>, vector<8x16xf32>
    %c13_i32_72 = arith.constant 13 : i32
    %177 = tpu.dynamic_rotate %146 by %c13_i32_72 dim 1 : vector<8x16xf32>, i32 -> vector<8x16xf32>
    %cst_73 = arith.constant 0.000000e+00 : f32
    %178 = vector.shape_cast %63 : vector<1x16xi1> to vector<1x16xi1>
    %179 = vector.broadcast %178 : vector<1x16xi1> to vector<8x16xi1>
    %180 = vector.broadcast %cst_73 : f32 to vector<8x16xf32>
    %181 = arith.select %179, %177, %180 : vector<8x16xi1>, vector<8x16xf32>
    %c12_i32_74 = arith.constant 12 : i32
    %182 = tpu.dynamic_rotate %146 by %c12_i32_74 dim 1 : vector<8x16xf32>, i32 -> vector<8x16xf32>
    %cst_75 = arith.constant 0.000000e+00 : f32
    %183 = vector.shape_cast %72 : vector<1x16xi1> to vector<1x16xi1>
    %184 = vector.broadcast %183 : vector<1x16xi1> to vector<8x16xi1>
    %185 = vector.broadcast %cst_75 : f32 to vector<8x16xf32>
    %186 = arith.select %184, %182, %185 : vector<8x16xi1>, vector<8x16xf32>
    %187 = tpu.concatenate %151, %156, %161, %166, %146, %171, %176, %181, %186 in 0 : vector<8x16xf32>, vector<8x16xf32>, vector<8x16xf32>, vector<8x16xf32>, vector<8x16xf32>, vector<8x16xf32>, vector<8x16xf32>, vector<8x16xf32>, vector<8x16xf32> -> vector<72x16xf32>
    %cst_76 = arith.constant dense<0.000000e+00> : vector<24x16xf32>
    %188 = tpu.matmul %143, %187, %cst_76 {dimension_numbers = #tpu.dot_dimension_numbers<[1], [0], [0], [1], [0, 0, 1, 1], [], []>} : vector<24x72xf32>, vector<72x16xf32>, vector<24x16xf32> -> vector<24x16xf32>
    %c1_i32_77 = arith.constant 1 : i32
    %189 = tpu.dynamic_rotate %141 by %c1_i32_77 dim 1 : vector<32x16xf32>, i32 -> vector<32x16xf32>
    %190 = vector.shape_cast %74 : vector<1x16xi1> to vector<1x16xi1>
    %191 = vector.broadcast %190 : vector<1x16xi1> to vector<32x16xi1>
    %192 = arith.select %191, %189, %141 : vector<32x16xi1>, vector<32x16xf32>
    %c15_i32_78 = arith.constant 15 : i32
    %193 = tpu.dynamic_rotate %141 by %c15_i32_78 dim 1 : vector<32x16xf32>, i32 -> vector<32x16xf32>
    %194 = vector.shape_cast %76 : vector<1x16xi1> to vector<1x16xi1>
    %195 = vector.broadcast %194 : vector<1x16xi1> to vector<32x16xi1>
    %196 = arith.select %195, %193, %141 : vector<32x16xi1>, vector<32x16xf32>
    %197 = arith.maximumf %192, %141 : vector<32x16xf32>
    %198 = arith.maximumf %197, %196 : vector<32x16xf32>
    %cst_79 = arith.constant dense<0.000000e+00> : vector<8x16xf32>
    %199 = tpu.matmul %144, %198, %cst_79 {dimension_numbers = #tpu.dot_dimension_numbers<[1], [0], [0], [1], [0, 0, 1, 1], [], []>} : vector<8x32xf32>, vector<32x16xf32>, vector<8x16xf32> -> vector<8x16xf32>
    %200 = tpu.concatenate %188, %199 in 0 : vector<24x16xf32>, vector<8x16xf32> -> vector<32x16xf32>
    %201 = vector.broadcast %145 : vector<32x1xf32> to vector<32x16xf32>
    %202 = arith.addf %200, %201 : vector<32x16xf32>
    %cst_80 = arith.constant 0.000000e+00 : f32
    %203 = vector.broadcast %cst_80 : f32 to vector<32x16xf32>
    %204 = arith.maximumf %202, %203 : vector<32x16xf32>
    %c0_81 = arith.constant 0 : index
    %c0_82 = arith.constant 0 : index
    %c0_83 = arith.constant 0 : index
    %205 = vector.load %arg12[%c0_81, %c0_82, %c0_83] : memref<1x32x16xf32, #tpu.memory_space<vmem>>, vector<1x32x16xf32>
    %206 = vector.shape_cast %205 : vector<1x32x16xf32> to vector<32x16xf32>
    %207 = vector.shape_cast %204 : vector<32x16xf32> to vector<1x32x16xf32>
    tpu.vector_store %arg12[%c0_81, %c0_82, %c0_83], %207 {strides = array<i32>} : memref<1x32x16xf32, #tpu.memory_space<vmem>>, vector<1x32x16xf32>,
    %cst_84 = arith.constant dense<0.000000e+00> : vector<32xf32>
    %208 = vector.multi_reduction <add>, %204, %cst_84 [1] : vector<32x16xf32> to vector<32xf32>
    %209 = vector.shape_cast %208 : vector<32xf32> to vector<32x1xf32>
    %cst_85 = arith.constant 6.250000e-02 : f32
    %210 = vector.broadcast %cst_85 : f32 to vector<32x1xf32>
    %211 = arith.mulf %209, %210 : vector<32x1xf32>
    %c0_86 = arith.constant 0 : index
    %c0_87 = arith.constant 0 : index
    %212 = vector.load %arg10[%c0_86, %c0_87] : memref<5x32xf32, #tpu.memory_space<vmem>>, vector<5x32xf32>
    %cst_88 = arith.constant dense<0.000000e+00> : vector<5x1xf32>
    %213 = tpu.matmul %212, %211, %cst_88 {dimension_numbers = #tpu.dot_dimension_numbers<[1], [0], [0], [1], [0, 0, 1, 1], [], []>} : vector<5x32xf32>, vector<32x1xf32>, vector<5x1xf32> -> vector<5x1xf32>
    %c0_89 = arith.constant 0 : index
    %c0_90 = arith.constant 0 : index
    %214 = vector.load %arg11[%c0_89, %c0_90] : memref<5x1xf32, #tpu.memory_space<vmem>>, vector<5x1xf32>
    %215 = arith.addf %213, %214 : vector<5x1xf32>
    %c0_91 = arith.constant 0 : index
    %c0_92 = arith.constant 0 : index
    %c0_93 = arith.constant 0 : index
    %216 = vector.load %arg13[%c0_91, %c0_92, %c0_93] : memref<1x5x1xf32, #tpu.memory_space<vmem>>, vector<1x5x1xf32>
    %217 = vector.shape_cast %216 : vector<1x5x1xf32> to vector<5x1xf32>
    %218 = vector.shape_cast %215 : vector<5x1xf32> to vector<1x5x1xf32>
    tpu.vector_store %arg13[%c0_91, %c0_92, %c0_93], %218 {strides = array<i32>} : memref<1x5x1xf32, #tpu.memory_space<vmem>>, vector<1x5x1xf32>,
    return
  }
  func.func @transform_0(%arg0: i32) -> (i32, i32, i32) {
    %c0_i32 = arith.constant 0 : i32
    %c0_i32_0 = arith.constant 0 : i32
    %c0_i32_1 = arith.constant 0 : i32
    return %arg0, %c0_i32, %c0_i32_0 : i32, i32, i32
  }
  func.func @transform_1(%arg0: i32) -> (i32, i32) {
    %c0_i32 = arith.constant 0 : i32
    %c0_i32_0 = arith.constant 0 : i32
    %c0_i32_1 = arith.constant 0 : i32
    return %c0_i32, %c0_i32_0 : i32, i32
  }
  func.func @transform_2(%arg0: i32) -> (i32, i32) {
    %c0_i32 = arith.constant 0 : i32
    %c0_i32_0 = arith.constant 0 : i32
    %c0_i32_1 = arith.constant 0 : i32
    return %c0_i32, %c0_i32_0 : i32, i32
  }
  func.func @transform_3(%arg0: i32) -> (i32, i32) {
    %c0_i32 = arith.constant 0 : i32
    %c0_i32_0 = arith.constant 0 : i32
    %c0_i32_1 = arith.constant 0 : i32
    return %c0_i32, %c0_i32_0 : i32, i32
  }
  func.func @transform_4(%arg0: i32) -> (i32, i32) {
    %c0_i32 = arith.constant 0 : i32
    %c0_i32_0 = arith.constant 0 : i32
    %c0_i32_1 = arith.constant 0 : i32
    return %c0_i32, %c0_i32_0 : i32, i32
  }
  func.func @transform_5(%arg0: i32) -> (i32, i32) {
    %c0_i32 = arith.constant 0 : i32
    %c0_i32_0 = arith.constant 0 : i32
    %c0_i32_1 = arith.constant 0 : i32
    return %c0_i32, %c0_i32_0 : i32, i32
  }
  func.func @transform_6(%arg0: i32) -> (i32, i32) {
    %c0_i32 = arith.constant 0 : i32
    %c0_i32_0 = arith.constant 0 : i32
    %c0_i32_1 = arith.constant 0 : i32
    return %c0_i32, %c0_i32_0 : i32, i32
  }
  func.func @transform_7(%arg0: i32) -> (i32, i32) {
    %c0_i32 = arith.constant 0 : i32
    %c0_i32_0 = arith.constant 0 : i32
    %c0_i32_1 = arith.constant 0 : i32
    return %c0_i32, %c0_i32_0 : i32, i32
  }
  func.func @transform_8(%arg0: i32) -> (i32, i32) {
    %c0_i32 = arith.constant 0 : i32
    %c0_i32_0 = arith.constant 0 : i32
    %c0_i32_1 = arith.constant 0 : i32
    return %c0_i32, %c0_i32_0 : i32, i32
  }
  func.func @transform_9(%arg0: i32) -> (i32, i32) {
    %c0_i32 = arith.constant 0 : i32
    %c0_i32_0 = arith.constant 0 : i32
    %c0_i32_1 = arith.constant 0 : i32
    return %c0_i32, %c0_i32_0 : i32, i32
  }
  func.func @transform_10(%arg0: i32) -> (i32, i32) {
    %c0_i32 = arith.constant 0 : i32
    %c0_i32_0 = arith.constant 0 : i32
    %c0_i32_1 = arith.constant 0 : i32
    return %c0_i32, %c0_i32_0 : i32, i32
  }
  func.func @transform_11(%arg0: i32) -> (i32, i32, i32) {
    %c0_i32 = arith.constant 0 : i32
    %c0_i32_0 = arith.constant 0 : i32
    %c0_i32_1 = arith.constant 0 : i32
    return %arg0, %c0_i32, %c0_i32_0 : i32, i32, i32
  }
  func.func @transform_12(%arg0: i32) -> (i32, i32, i32) {
    %c0_i32 = arith.constant 0 : i32
    %c0_i32_0 = arith.constant 0 : i32
    %c0_i32_1 = arith.constant 0 : i32
    return %arg0, %c0_i32, %c0_i32_0 : i32, i32, i32
  }
}

</mosaic_0001>

<bundles_post_ra>
// kernel: inceptiontime_cam_forward.1
= control target key start
LH: loop header
LB: loop body
LE: loop exit
PB: predicated region body
PF: predicated region fallthrough
CT: control target
= control target key end

     0   :  { %s1217_s21 = smov 0   ;;  %s1528_s0 = inlined_call_operand.vmem [shape: f32[2,4,16], index: 0, kind: input, shape index: {}]   ;;  %s1529_s1 = inlined_call_operand.vmem [shape: f32[8,4], index: 1, kind: input, shape index: {}]   ;;  %s1530_s2 = inlined_call_operand.vmem [shape: f32[24,72], index: 2, kind: input, shape index: {}]   ;;  %s1531_s3 = inlined_call_operand.vmem [shape: f32[8,4], index: 3, kind: input, shape index: {}]   ;;  %s1532_s4 = inlined_call_operand.vmem [shape: f32[32,1], index: 4, kind: input, shape index: {}]   ;;  %s1533_s5 = inlined_call_operand.vmem [shape: f32[8,32], index: 5, kind: input, shape index: {}]   ;;  %s1534_s6 = inlined_call_operand.vmem [shape: f32[24,72], index: 6, kind: input, shape index: {}]   ;;  %s1535_s7 = inlined_call_operand.vmem [shape: f32[8,32], index: 7, kind: input, shape index: {}]   ;;  %s1536_s8 = inlined_call_operand.vmem [shape: f32[32,1], index: 8, kind: input, shape index: {}]   ;;  %s1537_s9 = inlined_call_operand.vmem [shape: f32[5,32], index: 9, kind: input, shape index: {}]   ;;  %s1538_s10 = inlined_call_operand.vmem [shape: f32[5,1], index: 10, kind: input, shape index: {}]   ;;  %s1539_s11 = inlined_call_operand.vmem [shape: f32[2,32,16], index: 11, kind: output, shape index: {0}]   ;;  %s1540_s12 = inlined_call_operand.vmem [shape: f32[2,5,1], index: 12, kind: output, shape index: {1}]  }
   0x1 LB: > { %s1023_s22 = sadd.s32 4294967295, %s1140_s21   ;;  %p1027_p0 = scmp.ge.s32.totalorder %s1140_s21, 1  ;;  %s1140_s21 = sphi %s1217_s21, %s23_s21  }
   0x2   : > { %p364_p1 = scmp.lt.s32.totalorder %s1140_s21, 3 }
   0x4   : > { %p365_p2 = pnand %p1027_p0, %p364_p1 }
   0x5   : > { %p409_p3 = scmp.lt.s32.totalorder (!%p365_p2), %s1023_s22, 1  ;;  %s1142_s29 = smov (!%p365_p2), 16  }
   0x6   : > { %368 = sbr.rel (%p365_p2) target bundleno = 1565 (0x61d), region = 64  ;;  %s1143_s30 = smov (!%p365_p2), 126  }
   0x7   : > { %s1144_s13 = smov (!%p365_p2), 124   ;;  %s1145_s14 = smov (!%p365_p2), 127  }
   0x8   : > { %s1146_s15 = smov (!%p365_p2), 114   ;;  %s1147_s16 = smov (!%p365_p2), 125  }
   0x9   : > { %s1148_s17 = smov (!%p365_p2), 115   ;;  %s1149_s18 = smov (!%p365_p2), 113  }
   0xa   : > { %s1150_s19 = smov (!%p365_p2), 116  }
   0xb   : > { %s1553_s22 = smov (!%p409_p3, %s1023_s22), 1  ;;  %vm472_vm0 = vcmask 1043456   ;;  %v459_v0 = vld [vmem:[%s1529_s1] sm:$0xff]  ;;  %vm468_vm1 = vcmask 31744   ;;  %vm496_vm2 = vcmask 1047680   ;;  %v422_v11 = vlaneseq  ;;  %v465_v20 = vld [vmem:[%s1532_s4 + $0x8] sm:$0xff] }
   0xc   : > { %s1028_s23 = sshll.u32 %s1553_s22, 2  ;;  %v466_v21 = vld [vmem:[%s1532_s4 + $0x10] sm:$0xff]  ;;  %v1151_v23 = vmov 0   ;;  %v467_v24 = vld [vmem:[%s1532_s4 + $0x18] sm:$0xff]  ;;  %v464_v32 = vld [vmem:[%s1532_s4] sm:$0xff] }
   0xd   : > { %s412_s26 = scalar_lea.vmem %s1528_s0, %s1028_s23  ;;  %v1265_v12 = vand.u32 127, %v422_v11  ;;  %1093 = vset.pattern.permute.xlu1 %v1151_v23  ;;  %1092 = vset.pattern.permute.xlu0 %v1151_v23  ;;  %v460_v37 = vld [vmem:[%s1530_s2] sm:$0xff]  ;;  %v461_v44 = vld [vmem:[%s1530_s2 + $0x8] sm:$0xff]  ;;  %v462_v47 = vld [vmem:[%s1530_s2 + $0x10] sm:$0xff] }
   0xe   : > { %v1234_v1 = vld [vmem:[%s412_s26] sm:$0xf]  ;;  %1091 = vset.pattern.permute.xlu2 %v1151_v23 }
   0xf   : > { %1032 = vmatpush.msk.msra.mxu0 %vm472_vm0, %v1234_v1  ;;  %v1268_v13 = vadd.s32 4, %v1265_v12  ;;  %v1274_v15 = vadd.s32 3, %v1265_v12  ;;  %v1280_v17 = vadd.s32 2, %v1265_v12  ;;  %v1283_v18 = vadd.s32 1, %v1265_v12  ;;  %v463_v46 = vld [vmem:[%s1531_s3] sm:$0xff] }
  0x10   : > { %1033 = vmatmul.msk.f32.vlgmr.msra.gmra.mxu0 %vm468_vm1, %v459_v0  ;;  %v436_v19 = vadd.s32 4294967295, %v1265_v12  ;;  %v432_v22 = vadd.s32 4294967294, %v1265_v12  ;;  %v428_v27 = vadd.s32 4294967293, %v1265_v12  ;;  %v424_v29 = vadd.s32 4294967292, %v1265_v12 }
  0x11   : > { %vm454_vm3 = vcmp.lt.s32.totalorder %v1268_v13, 16  ;;  %vm450_vm4 = vcmp.lt.s32.totalorder %v1274_v15, 16  ;;  %vm446_vm5 = vcmp.lt.s32.totalorder %v1280_v17, 16  ;;  %vm1541_vm6 = vcmp.lt.s32.totalorder %v1283_v18, 16 }
  0x12   : > { %vm437_vm7 = vcmp.ge.s32.totalorder %v436_v19, 0  ;;  %vm438_vm8 = vcmp.lt.s32.totalorder %v436_v19, 16  ;;  %vm433_vm9 = vcmp.ge.s32.totalorder %v432_v22, 0  ;;  %vm434_vm10 = vcmp.lt.s32.totalorder %v432_v22, 16 }
  0x13   : > { %vm1304_vm11 = vmand %vm437_vm7, %vm438_vm8  ;;  %vm429_vm12 = vcmp.ge.s32.totalorder %v428_v27, 0  ;;  %vm430_vm13 = vcmp.lt.s32.totalorder %v428_v27, 16  ;;  %vm425_vm15 = vcmp.ge.s32.totalorder %v424_v29, 0 }
  0x14   : > { %vm1309_vm14 = vmand %vm433_vm9, %vm434_vm10  ;;  %vm552_vm9 = vcmask 588800   ;;  %vm457_vm10 = vcmp.le.s32.totalorder %v1265_v12, 14 }
  0x15   : > { %vm1318_vm7 = vmand %vm429_vm12, %vm430_vm13 }
  0x8d   : > { %v1239_v2 = vpop.f32.mrf.mxu0 }
  0x8e   : > { %497 = vrot.lane.b32.xlu0 %v1239_v2, %s1142_s29 }
  0x96   : > { %588 = vrot.lane.b32.xlu0 %v1234_v1, %s1142_s29 }
 0x100   : > { %v498_v3 = vpop.permute.xlu0 %497 }
 0x101   : > { %v499_v4 = vsel %vm496_vm2, %v498_v3, %v1239_v2 }
 0x102   : > { %500 = vrot.lane.b32.xlu1 %v499_v4, %s1142_s29 }
 0x108   : > { %v589_v5 = vpop.permute.xlu0 %588 }
 0x109   : > { %v590_v6 = vsel %vm496_vm2, %v589_v5, %v1234_v1 }
 0x10a   : > { %591 = vrot.lane.b32.xlu1 %v590_v6, %s1142_s29 }
 0x174   : > { %v501_v7 = vpop.permute.xlu1 %500 }
 0x175   : > { %v502_v8 = vsel %vm496_vm2, %v501_v7, %v1239_v2 }
 0x176   : > { %536 = vrot.lane.b32.xlu0 %v502_v8, %s1143_s30  ;;  %548 = vrot.lane.b32.xlu2 %v502_v8, %s1144_s13 }
 0x177   : > { %530 = vrot.lane.b32.xlu1 %v502_v8, %s1145_s14 }
 0x17c   : > { %v592_v9 = vpop.permute.xlu1 %591 }
 0x17d   : > { %v593_v10 = vsel %vm496_vm2, %v592_v9, %v1234_v1 }
 0x17e   : > { %518 = vrot.lane.b32.xlu0 %v502_v8, %s1146_s15  ;;  %542 = vrot.lane.b32.xlu2 %v502_v8, %s1147_s16 }
 0x17f   : > { %512 = vrot.lane.b32.xlu1 %v502_v8, %s1148_s17 }
 0x186   : > { %524 = vrot.lane.b32.xlu2 %v502_v8, %s1149_s18  ;;  %597 = vrot.lane.b32.xlu0 %v593_v10, %s1149_s18 }
 0x187   : > { %603 = vrot.lane.b32.xlu1 %v593_v10, %s1145_s14 }
 0x18e   : > { %506 = vrot.lane.b32.xlu2 %v502_v8, %s1150_s19  ;;  %647 = vperm.xlu0 %1092, %v466_v21  }
 0x18f   : > { %642 = vperm.xlu1 %1093, %v465_v20  }
 0x196   : > { %652 = vperm.xlu2 %1091, %v467_v24  }
 0x19e   : > { %637 = vperm.xlu2 %1091, %v464_v32  }
 0x1d0   : > { %v549_v14 = vpop.permute.xlu2 %548 }
 0x1d1   : > { %1034 = vmatpush.msk.msra.mxu1 %vm454_vm3, %v549_v14 }
 0x1d8   : > { %v543_v16 = vpop.permute.xlu2 %542 }
 0x1d9   : > { %1035 = vmatpush.msk.msra.mxu1 %vm450_vm4, %v543_v16 }
 0x1e0   : > { %v525_v28 = vpop.permute.xlu2 %524 }
 0x1e8   : > { %v537_v25 = vpop.permute.xlu0 %536  ;;  %v507_v38 = vpop.permute.xlu2 %506 }
 0x1e9   : > { %v531_v26 = vpop.permute.xlu1 %530  ;;  %1036 = vmatpush.msk.msra.mxu1 %vm446_vm5, %v537_v25 }
 0x1eb   : > { %1037 = vmatpush.msk.msra.mxu1 %vm1541_vm6, %v531_v26  ;;  %vm426_vm6 = vcmp.lt.s32.totalorder %v424_v29, 16 }
 0x1ec   : > { %vm1324_vm8 = vmand %vm425_vm15, %vm426_vm6  ;;  %vm456_vm6 = vcmp.ge.s32.totalorder %v1265_v12, 1 }
 0x1ed   : > { %573 = vmatpush.msra.mxu1 %v1239_v2  ;;  %v663_v2 = vld [vmem:[%s1533_s5] sm:$0xff] }
 0x1ef   : > { %1038 = vmatpush.msk.msra.mxu1 %vm1304_vm11, %v525_v28 }
 0x1f0   : > { %v519_v33 = vpop.permute.xlu0 %518  ;;  %v653_v48 = vpop.permute.xlu2 %652 }
 0x1f1   : > { %v513_v35 = vpop.permute.xlu1 %512  ;;  %1039 = vmatpush.msk.msra.mxu1 %vm1309_vm14, %v519_v33 }
 0x1f3   : > { %1040 = vmatpush.msk.msra.mxu1 %vm1318_vm7, %v513_v35 }
 0x1f5   : > { %1041 = vmatpush.msk.msra.mxu1 %vm1324_vm8, %v507_v38 }
 0x1f6   : > { %1042 = vmatmul.msk.f32.vlgmr.msra.gmra.mxu1 %vm552_vm9, %v460_v37 }
 0x1f8   : > { %v598_v39 = vpop.permute.xlu0 %597  ;;  %v638_v50 = vpop.permute.xlu2 %637 }
 0x1f9   : > { %v604_v40 = vpop.permute.xlu1 %603  ;;  %v600_v41 = vsel %vm456_vm6, %v598_v39, %v1234_v1 }
 0x1fa   : > { %v607_v42 = vmax.f32 %v600_v41, %v1234_v1  ;;  %v606_v43 = vsel %vm457_vm10, %v604_v40, %v1234_v1  ;;  %v671_v41 = vld [vmem:[%s1536_s8 + $0x18] sm:$0xff] }
 0x1fc   : > { %v608_v45 = vmax.f32 %v607_v42, %v606_v43  ;;  %v670_v42 = vld [vmem:[%s1536_s8 + $0x10] sm:$0xff]  ;;  %v669_v43 = vld [vmem:[%s1536_s8 + $0x8] sm:$0xff] }
 0x1fe   : > { %1043 = vmatmul.msk.f32.gmra.mxu1 %vm552_vm9, %v461_v44  ;;  %1045 = vmatpush.msk.msra.mxu2 %vm472_vm0, %v608_v45  ;;  %vm672_vm0 = vcmask 261120   ;;  %v668_v44 = vld [vmem:[%s1536_s8] sm:$0xff] }
 0x1ff   : > { %1046 = vmatmul.msk.f32.vlgmr.msra.gmra.mxu2 %vm468_vm1, %v463_v46  ;;  %vm1550_vm1 = vcmp.lt.s32.totalorder %v1283_v18, 16 }
 0x200   : > { %v648_v58 = vpop.permute.xlu0 %647 }
 0x201   : > { %v643_v51 = vpop.permute.xlu1 %642 }
 0x206   : > { %1044 = vmatmul.msk.f32.gmra.mxu1 %vm552_vm9, %v462_v47 }
 0x273   : > { %v579_v49 = vpop.f32.mrf.mxu1 }
 0x274   : > { %v655_v52 = vadd.f32 %v638_v50, %v579_v49 }
 0x276   : > { %v1358_v55 = vmax.f32 %v655_v52, 0.0 }
 0x27b   : > { %v582_v53 = vpop.f32.mrf.mxu1 }
 0x27c   : > { %v656_v54 = vadd.f32 %v643_v51, %v582_v53 }
 0x27e   : > { %v1360_v56 = vmax.f32 %v656_v54, 0.0 }
 0x280   : > { %v1099_v57 = vpack.i.bf16 %v1358_v55, %v1360_v56 }
 0x282   : > { %1100 = vrot.lane.b32.xlu0 %v1099_v57, %s1142_s29  ;;  %v632_v59 = vpop.f32.mrf.mxu2 }
 0x283   : > { %v658_v60 = vadd.f32 %v653_v48, %v632_v59  ;;  %v585_v61 = vpop.f32.mrf.mxu1 }
 0x284   : > { %v657_v62 = vadd.f32 %v648_v58, %v585_v61  ;;  %v666_v61 = vld [vmem:[%s1534_s6 + $0x10] sm:$0xff] }
 0x285   : > { %v1365_v63 = vmax.f32 %v658_v60, 0.0  ;;  %v664_v60 = vld [vmem:[%s1534_s6] sm:$0xff] }
 0x286   : > { %v1367_v0 = vmax.f32 %v657_v62, 0.0 }
 0x287   : > { %688 = vmatpush.msra.mxu3 %v1365_v63 }
 0x288   : > { %v1094_v1 = vpack.i.bf16 %v1367_v0, %v1365_v63 }
 0x289   : > { %689 = vmatpush.msra.mxu3 %v1367_v0 }
 0x28a   : > { %1095 = vrot.lane.b32.xlu2 %v1094_v1, %s1142_s29 }
 0x28b   : > { %690 = vmatpush.msra.mxu3 %v1360_v56 }
 0x28d   : > { %691 = vmatpush.msra.mxu3 %v1358_v55 }
 0x28e   : > { %1047 = vmatmul.msk.f32.vlgmr.msra.gmra.mxu3 %vm672_vm0, %v663_v2 }
 0x2e4   : > { %v1096_v3 = vpop.permute.xlu2 %1095 }
 0x2e5   : > { %v1098_v4 = vunpack.i.h.bf16 %v1096_v3  ;;  %v1097_v5 = vunpack.i.l.bf16 %v1096_v3 }
 0x2e7   : > { %v778_v6 = vsel %vm496_vm2, %v1098_v4, %v1367_v0  ;;  %v781_v7 = vsel %vm496_vm2, %v1097_v5, %v1365_v63 }
 0x2e8   : > { %v1104_v8 = vpack.i.bf16 %v778_v6, %v781_v7 }
 0x2ea   : > { %1105 = vrot.lane.b32.xlu2 %v1104_v8, %s1142_s29 }
 0x2f4   : > { %v1101_v9 = vpop.permute.xlu0 %1100 }
 0x2f5   : > { %v1103_v10 = vunpack.i.h.bf16 %v1101_v9  ;;  %v1102_v11 = vunpack.i.l.bf16 %v1101_v9 }
 0x2f7   : > { %v772_v14 = vsel %vm496_vm2, %v1103_v10, %v1358_v55  ;;  %v775_v16 = vsel %vm496_vm2, %v1102_v11, %v1360_v56 }
 0x2f8   : > { %v1109_v19 = vpack.i.bf16 %v772_v14, %v775_v16 }
 0x2fa   : > { %1110 = vrot.lane.b32.xlu0 %v1109_v19, %s1142_s29  ;;  %v667_v19 = vld [vmem:[%s1535_s7] sm:$0xff] }
 0x311   : > { %v693_v20 = vpop.f32.mrf.mxu3 }
 0x312   : > { %696 = vrot.lane.b32.xlu1 %v693_v20, %s1142_s29 }
 0x344   : > { %v1106_v23 = vpop.permute.xlu2 %1105 }
 0x345   : > { %v1108_v26 = vunpack.i.h.bf16 %v1106_v23  ;;  %v1107_v27 = vunpack.i.l.bf16 %v1106_v23 }
 0x347   : > { %v792_v28 = vsel %vm496_vm2, %v1108_v26, %v1367_v0  ;;  %v793_v29 = vsel %vm496_vm2, %v1107_v27, %v1365_v63 }
 0x348   : > { %v1119_v32 = vpack.i.bf16 %v792_v28, %v793_v29 }
 0x36c   : > { %v1111_v33 = vpop.permute.xlu0 %1110 }
 0x36d   : > { %v1113_v35 = vunpack.i.h.bf16 %v1111_v33  ;;  %v1112_v37 = vunpack.i.l.bf16 %v1111_v33 }
 0x36f   : > { %v790_v38 = vsel %vm496_vm2, %v1113_v35, %v1358_v55  ;;  %v791_v39 = vsel %vm496_vm2, %v1112_v37, %v1360_v56 }
 0x370   : > { %v1124_v40 = vpack.i.bf16 %v790_v38, %v791_v39 }
 0x384   : > { %v697_v21 = vpop.permute.xlu1 %696 }
 0x385   : > { %v698_v22 = vsel %vm496_vm2, %v697_v21, %v693_v20 }
 0x386   : > { %699 = vrot.lane.b32.xlu1 %v698_v22, %s1142_s29  ;;  %s1063_s29 = sshll.u32 %s1553_s22, 5 }
 0x3f8   : > { %v700_v24 = vpop.permute.xlu1 %699 }
 0x3f9   : > { %v701_v25 = vsel %vm496_vm2, %v700_v24, %v693_v20  ;;  %vm1551_vm2 = vmmov %vm1550_vm1 }
 0x3fa   : > { %727 = vrot.lane.b32.xlu2 %v701_v25, %s1147_s16  ;;  %731 = vrot.lane.b32.xlu1 %v701_v25, %s1144_s13  ;;  %s417_s16 = scalar_lea.vmem %s1539_s11, %s1063_s29 }
 0x3fb   : > { %723 = vrot.lane.b32.xlu0 %v701_v25, %s1143_s30 }
 0x402   : > { %715 = vrot.lane.b32.xlu2 %v701_v25, %s1149_s18  ;;  %719 = vrot.lane.b32.xlu1 %v701_v25, %s1145_s14 }
 0x403   : > { %1120 = vrot.lane.b32.xlu0 %v1119_v32, %s1145_s14 }
 0x40a   : > { %707 = vrot.lane.b32.xlu2 %v701_v25, %s1148_s17  ;;  %1115 = vrot.lane.b32.xlu1 %v1119_v32, %s1149_s18 }
 0x40b   : > { %711 = vrot.lane.b32.xlu0 %v701_v25, %s1146_s15 }
 0x412   : > { %703 = vrot.lane.b32.xlu1 %v701_v25, %s1150_s19  ;;  %1125 = vrot.lane.b32.xlu2 %v1124_v40, %s1149_s18  ;;  %s1031_s19 = sshll.u32 %s1553_s22, 3 }
 0x413   : > { %1130 = vrot.lane.b32.xlu0 %v1124_v40, %s1145_s14  ;;  %s421_s28 = scalar_lea.vmem %s1540_s12, %s1031_s19 }
 0x41a   : > { %878 = vperm.xlu1 %1093, %v671_v41   ;;  %873 = vperm.xlu2 %1091, %v670_v42  }
 0x41b   : > { %868 = vperm.xlu0 %1092, %v669_v43  }
 0x422   : > { %863 = vperm.xlu1 %1093, %v668_v44  }
 0x454   : > { %v728_v45 = vpop.permute.xlu2 %727 }
 0x45c   : > { %v716_v46 = vpop.permute.xlu2 %715 }
 0x464   : > { %v708_v49 = vpop.permute.xlu2 %707 }
 0x46c   : > { %v732_v47 = vpop.permute.xlu1 %731  ;;  %v1126_v15 = vpop.permute.xlu2 %1125 }
 0x46d   : > { %v724_v48 = vpop.permute.xlu0 %723  ;;  %1048 = vmatpush.msk.msrb.mxu0 %vm454_vm3, %v732_v47  ;;  %1064 = vmatpush.msk.msrb.mxu2 %vm454_vm3, %v732_v47  ;;  %v1127_v54 = vunpack.i.l.bf16 %v1126_v15  ;;  %v1128_v31 = vunpack.i.h.bf16 %v1126_v15  ;;  %vm889_vm3 = vcmask 130048  }
 0x46f   : > { %1049 = vmatpush.msk.msrb.mxu0 %vm450_vm4, %v728_v45  ;;  %1065 = vmatpush.msk.msrb.mxu2 %vm450_vm4, %v728_v45  ;;  %v811_v1 = vsel %vm456_vm6, %v1127_v54, %v1360_v56  ;;  %v810_v5 = vsel %vm456_vm6, %v1128_v31, %v1358_v55  ;;  %vm935_vm4 = vcmask 4096  }
 0x470   : > { %v831_v36 = vmax.f32 %v811_v1, %v1360_v56  ;;  %v830_v14 = vmax.f32 %v810_v5, %v1358_v55 }
 0x471   : > { %1050 = vmatpush.msk.msrb.mxu0 %vm446_vm5, %v724_v48  ;;  %1066 = vmatpush.msk.msrb.mxu2 %vm446_vm5, %v724_v48 }
 0x474   : > { %v720_v50 = vpop.permute.xlu1 %719  ;;  %v874_v22 = vpop.permute.xlu2 %873 }
 0x475   : > { %v1121_v51 = vpop.permute.xlu0 %1120  ;;  %1051 = vmatpush.msk.msrb.mxu0 %vm1550_vm1, %v720_v50  ;;  %1067 = vmatpush.msk.msrb.mxu2 %vm1551_vm2, %v720_v50  ;;  %v911_v50 = vld [vmem:[%s1538_s10] sm:$0x1f] }
 0x476   : > { %v1122_v57 = vunpack.i.l.bf16 %v1121_v51  ;;  %v1123_v59 = vunpack.i.h.bf16 %v1121_v51 }
 0x477   : > { %755 = vmatpush.msrb.mxu0 %v693_v20  ;;  %1068 = vmatpush.msrb.mxu2 %v693_v20 }
 0x478   : > { %v829_v34 = vsel %vm457_vm10, %v1122_v57, %v1365_v63 }
 0x479   : > { %1052 = vmatpush.msk.msrb.mxu0 %vm1304_vm11, %v716_v46  ;;  %1069 = vmatpush.msk.msrb.mxu2 %vm1304_vm11, %v716_v46 }
 0x47c   : > { %v1116_v13 = vpop.permute.xlu1 %1115 }
 0x47d   : > { %v1118_v17 = vunpack.i.h.bf16 %v1116_v13  ;;  %v1117_v52 = vunpack.i.l.bf16 %v1116_v13  ;;  %v712_v53 = vpop.permute.xlu0 %711 }
 0x47e   : > { %1053 = vmatpush.msk.msrb.mxu0 %vm1309_vm14, %v712_v53  ;;  %1070 = vmatpush.msk.msrb.mxu2 %vm1309_vm14, %v712_v53 }
 0x47f   : > { %v813_v18 = vsel %vm456_vm6, %v1117_v52, %v1365_v63  ;;  %v812_v30 = vsel %vm456_vm6, %v1118_v17, %v1367_v0 }
 0x480   : > { %1054 = vmatpush.msk.msrb.mxu0 %vm1318_vm7, %v708_v49  ;;  %1071 = vmatpush.msk.msrb.mxu2 %vm1318_vm7, %v708_v49  ;;  %v833_v58 = vmax.f32 %v813_v18, %v1365_v63  ;;  %v832_v62 = vmax.f32 %v812_v30, %v1367_v0  ;;  %v828_v63 = vsel %vm457_vm10, %v1123_v59, %v1367_v0  ;;  %v665_v0 = vld [vmem:[%s1534_s6 + $0x8] sm:$0xff]  ;;  %v910_v49 = vld [vmem:[%s1537_s9] sm:$0x1f] }
 0x482   : > { %v837_v4 = vmax.f32 %v833_v58, %v829_v34  ;;  %v836_v8 = vmax.f32 %v832_v62, %v828_v63 }
 0x484   : > { %v704_v2 = vpop.permute.xlu1 %703 }
 0x485   : > { %v1131_v3 = vpop.permute.xlu0 %1130  ;;  %1055 = vmatpush.msk.msrb.mxu0 %vm1324_vm8, %v704_v2  ;;  %1072 = vmatpush.msk.msrb.mxu2 %vm1324_vm8, %v704_v2 }
 0x486   : > { %v1133_v6 = vunpack.i.h.bf16 %v1131_v3  ;;  %v1132_v7 = vunpack.i.l.bf16 %v1131_v3  ;;  %1056 = vmatmul.msk.f32.vlgmr.msrb.gmra.mxu0 %vm552_vm9, %v664_v60  ;;  %1058 = vmatmul.msk.f32.vlgmr.msrb.gmra.mxu2 %vm552_vm9, %v666_v61 }
 0x487   : > { %853 = vmatpush.msra.mxu2 %v837_v4 }
 0x488   : > { %v827_v9 = vsel %vm457_vm10, %v1132_v7, %v1360_v56  ;;  %v826_v10 = vsel %vm457_vm10, %v1133_v6, %v1358_v55 }
 0x489   : > { %854 = vmatpush.msra.mxu2 %v836_v8  ;;  %v835_v11 = vmax.f32 %v831_v36, %v827_v9  ;;  %v834_v16 = vmax.f32 %v830_v14, %v826_v10 }
 0x48b   : > { %855 = vmatpush.msra.mxu2 %v835_v11 }
 0x48c   : > { %v879_v12 = vpop.permute.xlu1 %878 }
 0x48d   : > { %856 = vmatpush.msra.mxu2 %v834_v16  ;;  %v869_v25 = vpop.permute.xlu0 %868 }
 0x48e   : > { %1057 = vmatmul.msk.f32.gmra.mxu0 %vm552_vm9, %v665_v0  ;;  %1059 = vmatmul.msk.f32.vlgmr.msra.gmra.mxu2 %vm672_vm0, %v667_v19 }
 0x494   : > { %v864_v56 = vpop.permute.xlu1 %863 }
 0x503   : > { %v761_v20 = vpop.f32.mrf.mxu0 }
 0x504   : > { %v881_v55 = vadd.f32 %v864_v56, %v761_v20 }
 0x506   : > { %v885_v21 = vmax.f32 %v881_v55, 0.0 }
 0x508   : > { %890 = vst.msk [vmem:[%s417_s16] sm:$0xff] %vm889_vm3, %v885_v21  ;;  %v894_v40 = vsel %vm889_vm3, %v885_v21, 0.0 }
 0x509   : > { %v767_v23 = vpop.f32.mrf.mxu2 }
 0x50a   : > { %v883_v24 = vadd.f32 %v874_v22, %v767_v23 }
 0x50b   : > { %v764_v26 = vpop.f32.mrf.mxu0 }
 0x50c   : > { %v887_v27 = vmax.f32 %v883_v24, 0.0  ;;  %v882_v28 = vadd.f32 %v869_v25, %v764_v26 }
 0x50e   : > { %892 = vst.msk [vmem:[%s417_s16 + $0x10] sm:$0xff] %vm889_vm3, %v887_v27  ;;  %v886_v29 = vmax.f32 %v882_v28, 0.0  ;;  %v900_v32 = vsel %vm889_vm3, %v887_v27, 0.0 }
 0x50f   : > { %901 = vadd.xlane.f32.xlu0 %v900_v32 }
 0x510   : > { %891 = vst.msk [vmem:[%s417_s16 + $0x8] sm:$0xff] %vm889_vm3, %v886_v29  ;;  %v897_v33 = vsel %vm889_vm3, %v886_v29, 0.0 }
 0x511   : > { %898 = vadd.xlane.f32.xlu1 %v897_v33  ;;  %v858_v35 = vpop.f32.mrf.mxu2 }
 0x512   : > { %v884_v37 = vadd.f32 %v879_v12, %v858_v35 }
 0x514   : > { %v888_v38 = vmax.f32 %v884_v37, 0.0 }
 0x516   : > { %893 = vst.msk [vmem:[%s417_s16 + $0x18] sm:$0xff] %vm889_vm3, %v888_v38  ;;  %v903_v39 = vsel %vm889_vm3, %v888_v38, 0.0 }
 0x517   : > { %904 = vadd.xlane.f32.xlu2 %v903_v39 }
 0x51f   : > { %895 = vadd.xlane.f32.xlu2 %v894_v40 }
 0x582   : > { %v902_v41 = vpop.xlane.xlu0 %901 }
 0x583   : > { %v908_v45 = vmul.f32 0.0625, %v902_v41 }
 0x584   : > { %v899_v44 = vpop.xlane.xlu1 %898 }
 0x585   : > { %v907_v46 = vmul.f32 0.0625, %v899_v44 }
 0x58a   : > { %v905_v42 = vpop.xlane.xlu2 %904 }
 0x58b   : > { %v909_v43 = vmul.f32 0.0625, %v905_v42 }
 0x58d   : > { %927 = vmatpush.msrb.mxu3 %v909_v43 }
 0x58f   : > { %928 = vmatpush.msrb.mxu3 %v908_v45 }
 0x591   : > { %929 = vmatpush.msrb.mxu3 %v907_v46 }
 0x592   : > { %v896_v47 = vpop.xlane.xlu2 %895 }
 0x593   : > { %v906_v48 = vmul.f32 0.0625, %v896_v47 }
 0x595   : > { %930 = vmatpush.msrb.mxu3 %v906_v48 }
 0x596   : > { %1060 = vmatmul.msk.f32.vlgmr.msrb.gmra.mxu3 %vm672_vm0, %v910_v49 }
 0x619   : > { %v932_v51 = vpop.f32.mrf.mxu3 }
 0x61a   : > { %v933_v13 = vadd.f32 %v932_v51, %v911_v50 }
 0x61c   : > { %936 = vst.msk [vmem:[%s421_s28] sm:$0x1f] %vm935_vm4, %v933_v13 }
 0x61d PF: > { %s23_s21 = sadd.s32 1, %s1140_s21  }
 0x61e   : > { %p20_p4 = scmp.ge.s32.totalorder %s23_s21, 4  }
 0x620   :  { %22 = sbr.rel (!%p20_p4) target bundleno = 1 (0x1), region = 106 }

</bundles_post_ra>
